<compile_context>
chip_gen: v5e
topology: v5e:2x2
jax: 0.10.0
libtpu: 0.0.40
codegen_flags: <defaults>
</compile_context>

<pallas_src>
import functools
import math

import jax
import jax.numpy as jnp
from jax.experimental import pallas as pl
from jax.experimental.pallas import tpu as pltpu


# ----------------------------------------------------------------------------
# Pallas kernel: one pool-tap of Conv1d(k=5,s=5) + bias/pos + ReLU, accumulated
# over the innermost grid axis; finalize divides by the pool size.
# ----------------------------------------------------------------------------
def _conv_relu_pool_kernel(x_ref, w_ref, b_ref, o_ref, acc_ref, *, pool):
    # x_ref  : (tile_g, K*D)  bf16   windowed rows of one pool tap
    # w_ref  : (K*D, D)       bf16   flattened conv weight (resident)
    # b_ref  : (tile_g, D)    f32    conv bias + conv(position emb) for this tap
    # o_ref  : (tile_g, D)           pooled output tile (written at last tap)
    # acc_ref: (tile_g, D)    f32    scratch accumulator (persists across grid steps)
    k = pl.program_id(2)

    @pl.when(k == 0)
    def _init():
        acc_ref[...] = jnp.zeros_like(acc_ref)

    # Conv1d(k == stride) tap as one MXU matmul, f32 accumulation; epilogue on VPU in f32.
    y = jnp.dot(x_ref[...], w_ref[...], preferred_element_type=jnp.float32)
    acc_ref[...] += jnp.maximum(y + b_ref[...], 0.0)

    @pl.when(k == pool - 1)
    def _finalize():
        o_ref[...] = (acc_ref[...] * (1.0 / pool)).astype(o_ref.dtype)


def _pick_tile_g(lp):
    """Pooled-group tile size: full dim when small, else a multiple-of-8 divisor <= 256."""
    if lp <= 256:
        return lp
    for t in (256, 128, 64, 32, 16, 8):
        if lp % t == 0:
            return t
    return lp


# ----------------------------------------------------------------------------
# Module forward (glue is pure JAX; all conv/relu/pool compute is in the kernel)
# ----------------------------------------------------------------------------
def conv_compress_forward(params, x, *, kernel_window=5, stride=5, pool=5, tile_g=None):
    """ConvolutionalCompressionNetwork.forward.  x: (T, bs, S, D) -> (Lp, bs, D)."""
    assert kernel_window == stride, "conv-as-matmul windowing needs stride == kernel_window"
    T, bs, S, D = x.shape
    L = T * S
    Lc = (L - kernel_window) // stride + 1          # Conv1d output length (padding=0)
    Lp = (Lc - pool) // pool + 1                    # AvgPool1d output length (stride=pool)
    m_keep = Lp * pool                              # conv windows the pool actually consumes
    KD = kernel_window * D

    if tile_g is None:
        tile_g = _pick_tile_g(Lp)
    assert Lp % tile_g == 0

    # positions = embed(S - 1 - arange(S))
    positions = params['sent_pos_emb'][(S - 1) - jnp.arange(S)]          # (S, D)

    # PyTorch Conv1d weight (c_out, c_in, k) -> (k*c_in, c_out)
    w_flat = jnp.transpose(params['conv_w'], (2, 1, 0)).reshape(KD, D)   # f32

    # Fold the positional add through the conv by linearity: conv(x+pos) = conv(x)+conv(pos).
    # Input-independent, tiny, kept in f32, NOT tiled over batch (broadcast via index_map).
    pos_seq = jnp.tile(positions, (T, 1))[: m_keep * kernel_window]      # (m_keep*K, D)
    bias = jnp.dot(pos_seq.reshape(m_keep, KD), w_flat,
                   precision=jax.lax.Precision.HIGHEST) + params['conv_b'][None, :]
    bias_r = jnp.transpose(bias.reshape(Lp, pool, D), (1, 0, 2))         # (pool, Lp, D) f32

    # Windowed input, tap-major: xw[k, b, g, :] = window (g*pool + k) of batch b, bf16.
    # TODO(synk): at production sizes, stream (T_tile, 1, S, D) slices of x straight from HBM
    # via a BlockSpec with a squeezed batch dim and do the window flattening in-kernel, to
    # remove this wrapper transpose pass entirely (bf16 cast here already halves its bytes).
    x_seq = jnp.transpose(x, (1, 0, 2, 3)).reshape(bs, L, D)
    xw = jnp.transpose(
        x_seq[:, : m_keep * kernel_window, :].reshape(bs, Lp, pool, KD),
        (2, 0, 1, 3)).astype(jnp.bfloat16)                               # (pool, bs, Lp, KD)
    w_bf16 = w_flat.astype(jnp.bfloat16)

    flops = 2 * bs * m_keep * KD * D
    bytes_accessed = (xw.size * 2 + w_bf16.size * 2 + bias_r.size * 4
                      + bs * Lp * D * x.dtype.itemsize)

    # TODO(synk): for D < 128 the (tile_g, D) output block gives masked partial stores;
    # pad D to 128 (or pack pooled rows) if this tiny epilogue ever becomes store-bound.
    # For big tiles on v7x, size tile_g so 2*(tile_g*(KD+D)) bf16 + KD*D bf16 + 2*tile_g*D f32
    # stays well under the 32 MiB scoped VMEM (set vmem_limit_bytes explicitly if raised).
    out = pl.pallas_call(
        functools.partial(_conv_relu_pool_kernel, pool=pool),
        grid=(bs, Lp // tile_g, pool),
        out_shape=jax.ShapeDtypeStruct((bs, Lp, D), x.dtype),
        in_specs=[
            pl.BlockSpec((None, None, tile_g, KD), lambda b, g, k: (k, b, g, 0)),
            pl.BlockSpec((KD, D), lambda b, g, k: (0, 0)),
            pl.BlockSpec((None, tile_g, D), lambda b, g, k: (k, g, 0)),
        ],
        out_specs=pl.BlockSpec((None, tile_g, D), lambda b, g, k: (b, g, 0)),
        scratch_shapes=[pltpu.VMEM((tile_g, D), jnp.float32)],
        compiler_params=pltpu.CompilerParams(
            dimension_semantics=("parallel", "parallel", "arbitrary")),
        cost_estimate=pl.CostEstimate(flops=flops, transcendentals=0,
                                      bytes_accessed=bytes_accessed),
    )(xw, w_bf16, bias_r)

    # (bs, Lp, D) -> (Lp, bs, D), matching x.transpose(1,2).transpose(0,1) in the module.
    return jnp.transpose(out, (1, 0, 2))


# ----------------------------------------------------------------------------
# Independent pure-JAX reference (lax.conv, f32 HIGHEST) for numerical validation
# ----------------------------------------------------------------------------
def conv_compress_reference(params, x, *, kernel_window=5, stride=5, pool=5):
    T, bs, S, D = x.shape
    positions = params['sent_pos_emb'][(S - 1) - jnp.arange(S)]
    xp = x + positions[None, None, :, :]
    seq = jnp.transpose(xp, (1, 0, 2, 3)).reshape(bs, T * S, D)
    ncw = jnp.transpose(seq, (0, 2, 1))                                  # (bs, D, L)
    y = jax.lax.conv_general_dilated(
        ncw, params['conv_w'], window_strides=(stride,), padding='VALID',
        dimension_numbers=('NCH', 'OIH', 'NCH'),
        precision=jax.lax.Precision.HIGHEST)
    y = jnp.maximum(y + params['conv_b'][None, :, None], 0.0)            # (bs, D, Lc)
    Lc = y.shape[-1]
    Lp = (Lc - pool) // pool + 1
    y = y[:, :, :Lp * pool].reshape(bs, D, Lp, pool).mean(axis=-1)       # (bs, D, Lp)
    return jnp.transpose(y, (2, 0, 1))                                   # (Lp, bs, D)


# ----------------------------------------------------------------------------
# Deterministic example run
# ----------------------------------------------------------------------------
if __name__ == "__main__":
    key = jax.random.PRNGKey(0)
    k_x, k_pos, k_cw, k_cb = jax.random.split(key, 4)

    D = 32       # embed_dim
    S = 10       # max_ctx_sentences (sentence axis of x)
    T = 10       # tokens per sentence (leading axis of x)
    bs = 2
    K = 5        # kernel_window == stride

    params = {
        'sent_pos_emb': jax.random.normal(k_pos, (S, D), jnp.float32) * 0.02,
        'conv_w': jax.random.normal(k_cw, (D, D, K), jnp.float32) / math.sqrt(D * K),
        'conv_b': jax.random.normal(k_cb, (D,), jnp.float32) * 0.01,
    }
    x = jax.random.normal(k_x, (T, bs, S, D), jnp.float32)               # module input

    fwd = jax.jit(conv_compress_forward)
    out = fwd(params, x)
    jax.block_until_ready(out)

    # L = 100 -> Lc = 20 -> Lp = 4
    assert out.shape == (4, bs, D), out.shape

    ref = conv_compress_reference(params, x)
    err = float(jnp.max(jnp.abs(out - ref)))
    # bf16 inputs with f32 accumulation vs an f32 Precision.HIGHEST reference.
    assert err < 5e-2, f"max abs err vs reference: {err}"

    print("KERNEL_OK")
</pallas_src>

<mosaic_0001>
module attributes {stable_mosaic.version = 11 : i64} {
  func.func @_conv_relu_pool_kernel(%arg0: i32, %arg1: i32, %arg2: i32, %arg3: memref<1x1x4x160xbf16, #tpu.memory_space<vmem>>, %arg4: memref<160x32xbf16, #tpu.memory_space<vmem>>, %arg5: memref<1x4x32xf32, #tpu.memory_space<vmem>>, %arg6: memref<1x4x32xf32, #tpu.memory_space<vmem>>, %arg7: memref<4x32xf32, #tpu.memory_space<vmem>>) attributes {dimension_semantics = [#tpu.dimension_semantics<parallel>, #tpu.dimension_semantics<parallel>, #tpu.dimension_semantics<arbitrary>], iteration_bounds = array<i64: 2, 1, 5>, scalar_prefetch = 0 : i64, scratch_operands = 1 : i64, tpu.core_type = #tpu.core_type<tc>, window_params = [{transform_indices = @transform_0, window_bounds = array<i64: 1, 1, 4, 160>}, {pipeline_mode = #tpu.pipeline_mode<synchronous>, transform_indices = @transform_1, window_bounds = array<i64: 160, 32>}, {transform_indices = @transform_2, window_bounds = array<i64: 1, 4, 32>}, {transform_indices = @transform_3, window_bounds = array<i64: 1, 4, 32>}]} {
    %c0_i32 = arith.constant 0 : i32
    %0 = arith.cmpi eq, %arg2, %c0_i32 : i32
    %1 = arith.extui %0 : i1 to i32
    %c0_i32_0 = arith.constant 0 : i32
    %2 = arith.cmpi ne, %1, %c0_i32_0 : i32
    scf.if %2 {
      %cst_15 = arith.constant 0.000000e+00 : f32
      %18 = vector.broadcast %cst_15 : f32 to vector<4x32xf32>
      %c0_16 = arith.constant 0 : index
      %c0_17 = arith.constant 0 : index
      %19 = vector.load %arg7[%c0_16, %c0_17] : memref<4x32xf32, #tpu.memory_space<vmem>>, vector<4x32xf32>
      tpu.vector_store %arg7[%c0_16, %c0_17], %18 {strides = array<i32>} : memref<4x32xf32, #tpu.memory_space<vmem>>, vector<4x32xf32>,
    } else {
    }
    %c0 = arith.constant 0 : index
    %c0_1 = arith.constant 0 : index
    %c0_2 = arith.constant 0 : index
    %c0_3 = arith.constant 0 : index
    %3 = vector.load %arg3[%c0, %c0_1, %c0_2, %c0_3] : memref<1x1x4x160xbf16, #tpu.memory_space<vmem>>, vector<1x1x4x160xbf16>
    %4 = vector.shape_cast %3 : vector<1x1x4x160xbf16> to vector<4x160xbf16>
    %c0_4 = arith.constant 0 : index
    %c0_5 = arith.constant 0 : index
    %5 = vector.load %arg4[%c0_4, %c0_5] : memref<160x32xbf16, #tpu.memory_space<vmem>>, vector<160x32xbf16>
    %cst = arith.constant dense<0.000000e+00> : vector<4x32xf32>
    %6 = tpu.matmul %4, %5, %cst {dimension_numbers = #tpu.dot_dimension_numbers<[1], [0], [0], [1], [0, 0, 1, 1], [], []>} : vector<4x160xbf16>, vector<160x32xbf16>, vector<4x32xf32> -> vector<4x32xf32>
    %c0_6 = arith.constant 0 : index
    %c0_7 = arith.constant 0 : index
    %7 = vector.load %arg7[%c0_6, %c0_7] : memref<4x32xf32, #tpu.memory_space<vmem>>, vector<4x32xf32>
    %c0_8 = arith.constant 0 : index
    %c0_9 = arith.constant 0 : index
    %c0_10 = arith.constant 0 : index
    %8 = vector.load %arg5[%c0_8, %c0_9, %c0_10] : memref<1x4x32xf32, #tpu.memory_space<vmem>>, vector<1x4x32xf32>
    %9 = vector.shape_cast %8 : vector<1x4x32xf32> to vector<4x32xf32>
    %10 = arith.addf %6, %9 : vector<4x32xf32>
    %cst_11 = arith.constant 0.000000e+00 : f32
    %11 = vector.broadcast %cst_11 : f32 to vector<4x32xf32>
    %12 = arith.maximumf %10, %11 : vector<4x32xf32>
    %13 = arith.addf %7, %12 : vector<4x32xf32>
    %c0_12 = arith.constant 0 : index
    %c0_13 = arith.constant 0 : index
    %14 = vector.load %arg7[%c0_12, %c0_13] : memref<4x32xf32, #tpu.memory_space<vmem>>, vector<4x32xf32>
    tpu.vector_store %arg7[%c0_12, %c0_13], %13 {strides = array<i32>} : memref<4x32xf32, #tpu.memory_space<vmem>>, vector<4x32xf32>,
    %c4_i32 = arith.constant 4 : i32
    %15 = arith.cmpi eq, %arg2, %c4_i32 : i32
    %16 = arith.extui %15 : i1 to i32
    %c0_i32_14 = arith.constant 0 : i32
    %17 = arith.cmpi ne, %16, %c0_i32_14 : i32
    scf.if %17 {
      %c0_15 = arith.constant 0 : index
      %c0_16 = arith.constant 0 : index
      %18 = vector.load %arg7[%c0_15, %c0_16] : memref<4x32xf32, #tpu.memory_space<vmem>>, vector<4x32xf32>
      %cst_17 = arith.constant 2.000000e-01 : f32
      %19 = vector.broadcast %cst_17 : f32 to vector<4x32xf32>
      %20 = arith.mulf %18, %19 : vector<4x32xf32>
      %c0_18 = arith.constant 0 : index
      %c0_19 = arith.constant 0 : index
      %c0_20 = arith.constant 0 : index
      %21 = vector.load %arg6[%c0_18, %c0_19, %c0_20] : memref<1x4x32xf32, #tpu.memory_space<vmem>>, vector<1x4x32xf32>
      %22 = vector.shape_cast %21 : vector<1x4x32xf32> to vector<4x32xf32>
      %23 = vector.shape_cast %20 : vector<4x32xf32> to vector<1x4x32xf32>
      tpu.vector_store %arg6[%c0_18, %c0_19, %c0_20], %23 {strides = array<i32>} : memref<1x4x32xf32, #tpu.memory_space<vmem>>, vector<1x4x32xf32>,
    } else {
    }
    return
  }
  func.func @transform_0(%arg0: i32, %arg1: i32, %arg2: i32) -> (i32, i32, i32, i32) {
    %c0_i32 = arith.constant 0 : i32
    %c0_i32_0 = arith.constant 0 : i32
    return %arg2, %arg0, %arg1, %c0_i32 : i32, i32, i32, i32
  }
  func.func @transform_1(%arg0: i32, %arg1: i32, %arg2: i32) -> (i32, i32) {
    %c0_i32 = arith.constant 0 : i32
    %c0_i32_0 = arith.constant 0 : i32
    %c0_i32_1 = arith.constant 0 : i32
    return %c0_i32, %c0_i32_0 : i32, i32
  }
  func.func @transform_2(%arg0: i32, %arg1: i32, %arg2: i32) -> (i32, i32, i32) {
    %c0_i32 = arith.constant 0 : i32
    %c0_i32_0 = arith.constant 0 : i32
    return %arg2, %arg1, %c0_i32 : i32, i32, i32
  }
  func.func @transform_3(%arg0: i32, %arg1: i32, %arg2: i32) -> (i32, i32, i32) {
    %c0_i32 = arith.constant 0 : i32
    %c0_i32_0 = arith.constant 0 : i32
    return %arg0, %arg1, %c0_i32 : i32, i32, i32
  }
}

</mosaic_0001>

<bundles_post_ra>
// kernel: tile.9
= control target key start
LH: loop header
LB: loop body
LE: loop exit
PB: predicated region body
PF: predicated region fallthrough
CT: control target
= control target key end

     0   :  { %vm126_vm0 = vcmask 1043458   ;;  %s168_s6 = smov 3  ;;  %s171_s9 = smov 12  ;;  %vm131_vm1 = vcmask 1045508   ;;  %vm136_vm2 = vcmask 1047558   ;;  %vm4_vm3 = vcmask 261120   ;;  %s686_s0 = inlined_call_operand.vmem [shape: f32[10,10,32], index: 0, kind: input, shape index: {}]   ;;  %s687_s1 = inlined_call_operand.vmem [shape: f32[20,160], index: 1, kind: output, shape index: {}]  }
   0x1   :  { %v348_v0 = vld [vmem:[%s686_s0 + $0x63] ss:$5 sm:%s168_s6]   ;;  %s121_s10 = smov 3  ;;  %v349_v1 = vld [vmem:[%s686_s0 + $0x69] ss:$5 sm:%s171_s9]   ;;  %s124_s15 = smov 12 }
   0x2   :  { %v338_v2 = vld [vmem:[%s686_s0 + $0x3] ss:$5 sm:%s121_s10]   ;;  %s129_s16 = smov 48  ;;  %v174_v3 = vsel %vm126_vm0, %v349_v1, %v348_v0  ;;  %v339_v4 = vld [vmem:[%s686_s0 + $0x9] ss:$5 sm:%s124_s15]   ;;  %s134_s21 = smov 192 }
   0x3   :  { %v340_v5 = vld [vmem:[%s686_s0 + $0xf] ss:$5 sm:%s129_s16]   ;;  %s181_s22 = smov 3  ;;  %s380_s23 = smov 96   ;;  %v127_v6 = vsel %vm126_vm0, %v339_v4, %v338_v2  ;;  %v341_v7 = vld [vmem:[%s686_s0 + $0x15] ss:$5 sm:%s134_s21]  }
   0x4   :  { %175 = vrot.lane.b32.xlu1 %v174_v3, %s380_s23  ;;  %s184_s26 = smov 12  ;;  %s189_s27 = smov 48  ;;  %v132_v8 = vsel %vm131_vm1, %v340_v5, %v127_v6  ;;  %v351_v9 = vld [vmem:[%s686_s0 + $0x2] ss:$5 sm:%s181_s22]   ;;  %vm140_vm4 = vcmask 1048320   ;;  %vm200_vm5 = vcmask 785920  }
   0x5   :  { %v352_v10 = vld [vmem:[%s686_s0 + $0x8] ss:$5 sm:%s184_s26]   ;;  %s194_s3 = smov 192  ;;  %v137_v11 = vsel %vm136_vm2, %v341_v7, %v132_v8  ;;  %v353_v13 = vld [vmem:[%s686_s0 + $0xe] ss:$5 sm:%s189_s27]   ;;  %s143_s8 = smov 3 }
   0x6   :  { %v187_v12 = vsel %vm126_vm0, %v352_v10, %v351_v9  ;;  %v354_v14 = vld [vmem:[%s686_s0 + $0x14] ss:$5 sm:%s194_s3]   ;;  %s146_s9 = smov 12  ;;  %138 = vrot.lane.b32.xlu0 %v137_v11, %s380_s23  ;;  %s151_s12 = smov 48  ;;  %vm260_vm6 = vcmask 523520  }
   0x7   :  { %v192_v15 = vsel %vm131_vm1, %v353_v13, %v187_v12  ;;  %v342_v16 = vld [vmem:[%s686_s0 + $0x83] ss:$5 sm:%s143_s8]   ;;  %s156_s13 = smov 192  ;;  %v343_v17 = vld [vmem:[%s686_s0 + $0x89] ss:$5 sm:%s146_s9]   ;;  %s263_s18 = smov 3 }
   0x8   :  { %v344_v18 = vld [vmem:[%s686_s0 + $0x2f] ss:$5 sm:%s151_s12]   ;;  %v197_v19 = vsel %vm136_vm2, %v354_v14, %v192_v15  ;;  %v149_v20 = vsel %vm126_vm0, %v343_v17, %v342_v16  ;;  %v345_v21 = vld [vmem:[%s686_s0 + $0x35] ss:$5 sm:%s156_s13]   ;;  %s266_s24 = smov 12  ;;  %s271_s25 = smov 48 }
   0x9   :  { %v368_v22 = vld [vmem:[%s686_s0 + $0x81] ss:$5 sm:%s263_s18]   ;;  %v154_v23 = vsel %vm131_vm1, %v344_v18, %v149_v20  ;;  %v369_v24 = vld [vmem:[%s686_s0 + $0x87] ss:$5 sm:%s266_s24]   ;;  %s276_s28 = smov 192  ;;  %s241_s29 = smov 3 }
   0xa   :  { %v269_v25 = vsel %vm126_vm0, %v369_v24, %v368_v22  ;;  %v370_v26 = vld [vmem:[%s686_s0 + $0x2d] ss:$5 sm:%s271_s25]   ;;  %s244_s5 = smov 12  ;;  %s249_s6 = smov 48  ;;  %v159_v28 = vsel %vm136_vm2, %v345_v21, %v154_v23  ;;  %v371_v30 = vld [vmem:[%s686_s0 + $0x33] ss:$5 sm:%s276_s28]  }
   0xb   :  { %v364_v27 = vld [vmem:[%s686_s0 + $0x1] ss:$5 sm:%s241_s29]   ;;  %s381_s7 = smov 64   ;;  %v365_v29 = vld [vmem:[%s686_s0 + $0x7] ss:$5 sm:%s244_s5]   ;;  %s203_s10 = smov 3  ;;  %v274_v32 = vsel %vm131_vm1, %v370_v26, %v269_v25 }
   0xc   :  { %198 = vrot.lane.b32.xlu1 %v197_v19, %s381_s7  ;;  %v366_v31 = vld [vmem:[%s686_s0 + $0xd] ss:$5 sm:%s249_s6]   ;;  %s206_s15 = smov 12  ;;  %s211_s16 = smov 48  ;;  %v247_v33 = vsel %vm126_vm0, %v365_v29, %v364_v27  ;;  %v279_v40 = vsel %vm136_vm2, %v371_v30, %v274_v32 }
   0xd   :  { %s254_s17 = smov 192  ;;  %v355_v34 = vld [vmem:[%s686_s0 + $0x82] ss:$5 sm:%s203_s10]   ;;  %v356_v35 = vld [vmem:[%s686_s0 + $0x88] ss:$5 sm:%s206_s15]   ;;  %s216_s22 = smov 192  ;;  %v252_v41 = vsel %vm131_vm1, %v366_v31, %v247_v33 }
   0xe   :  { %160 = vrot.lane.b32.xlu0 %v159_v28, %s380_s23  ;;  %v209_v36 = vsel %vm126_vm0, %v356_v35, %v355_v34  ;;  %v357_v37 = vld [vmem:[%s686_s0 + $0x2e] ss:$5 sm:%s211_s16]   ;;  %s228_s27 = smov 3  ;;  %s231_s30 = smov 12 }
   0xf   :  { %v214_v38 = vsel %vm131_vm1, %v357_v37, %v209_v36  ;;  %v358_v39 = vld [vmem:[%s686_s0 + $0x34] ss:$5 sm:%s216_s22]   ;;  %v367_v42 = vld [vmem:[%s686_s0 + $0x13] ss:$5 sm:%s254_s17]   ;;  %s382_s4 = smov 32   ;;  %s288_s8 = smov 3 }
  0x10   :  { %v219_v43 = vsel %vm136_vm2, %v358_v39, %v214_v38  ;;  %v361_v44 = vld [vmem:[%s686_s0 + $0x62] ss:$5 sm:%s228_s27]   ;;  %v257_v45 = vsel %vm136_vm2, %v367_v42, %v252_v41  ;;  %v362_v46 = vld [vmem:[%s686_s0 + $0x68] ss:$5 sm:%s231_s30]   ;;  %s291_s9 = smov 12  ;;  %s49_s13 = smov 3 }
  0x11   :  { %220 = vrot.lane.b32.xlu2 %v219_v43, %s381_s7  ;;  %v234_v47 = vsel %vm126_vm0, %v362_v46, %v361_v44  ;;  %v374_v48 = vld [vmem:[%s686_s0 + $0x61] ss:$5 sm:%s288_s8]   ;;  %s55_s14 = smov 3  ;;  %s61_s15 = smov 3 }
  0x12   :  { %v375_v49 = vld [vmem:[%s686_s0 + $0x67] ss:$5 sm:%s291_s9]   ;;  %s67_s16 = smov 3  ;;  %s97_s17 = smov 3 }
  0x13   :  { %v294_v50 = vsel %vm126_vm0, %v375_v49, %v374_v48  ;;  %v314_v51 = vld [vmem:[%s686_s0 + $0x40] ss:$4 sm:%s49_s13]   ;;  %v316_v52 = vld [vmem:[%s686_s0 + $0x45] ss:$4 sm:%s55_s14]   ;;  %s103_s22 = smov 3  ;;  %s109_s27 = smov 3 }
  0x14   :  { %280 = vrot.lane.b32.xlu1 %v279_v40, %s382_s4  ;;  %315 = vst.msk [vmem:[%s687_s1 + $0x10] ss:$8 sm:$0x3] %vm4_vm3, %v314_v51   ;;  %v318_v53 = vld [vmem:[%s686_s0 + $0x50] ss:$4 sm:%s61_s15]   ;;  %s115_s3 = smov 3 }
  0x15   :  { %317 = vst.msk [vmem:[%s687_s1 + $0x11] ss:$8 sm:$0x3] %vm4_vm3, %v316_v52   ;;  %v320_v54 = vld [vmem:[%s686_s0 + $0x55] ss:$4 sm:%s67_s16]   ;;  %s73_s24 = smov 3 }
  0x16   :  { %258 = vrot.lane.b32.xlu0 %v257_v45, %s382_s4  ;;  %319 = vst.msk [vmem:[%s687_s1 + $0x12] ss:$8 sm:$0x3] %vm4_vm3, %v318_v53   ;;  %v330_v55 = vld [vmem:[%s686_s0 + $0x80] ss:$4 sm:%s97_s17]   ;;  %s79_s25 = smov 3 }
  0x17   :  { %321 = vst.msk [vmem:[%s687_s1 + $0x13] ss:$8 sm:$0x3] %vm4_vm3, %v320_v54   ;;  %v332_v56 = vld [vmem:[%s686_s0 + $0x85] ss:$4 sm:%s103_s22]   ;;  %s85_s26 = smov 3 }
  0x18   :  { %331 = vst.msk [vmem:[%s687_s1 + $0x20] ss:$8 sm:$0x3] %vm4_vm3, %v330_v55   ;;  %v334_v57 = vld [vmem:[%s686_s0 + $0x90] ss:$4 sm:%s109_s27]   ;;  %s91_s27 = smov 3 }
  0x19   :  { %235 = vrot.lane.b32.xlu2 %v234_v47, %s381_s7  ;;  %333 = vst.msk [vmem:[%s687_s1 + $0x21] ss:$8 sm:$0x3] %vm4_vm3, %v332_v56   ;;  %v336_v58 = vld [vmem:[%s686_s0 + $0x95] ss:$4 sm:%s115_s3]   ;;  %s2_s3 = smov 3 }
  0x1a   :  { %335 = vst.msk [vmem:[%s687_s1 + $0x22] ss:$8 sm:$0x3] %vm4_vm3, %v334_v57   ;;  %v322_v59 = vld [vmem:[%s686_s0 + $0x60] ss:$4 sm:%s73_s24]   ;;  %s7_s9 = smov 3 }
  0x1b   :  { %337 = vst.msk [vmem:[%s687_s1 + $0x23] ss:$8 sm:$0x3] %vm4_vm3, %v336_v58   ;;  %v324_v60 = vld [vmem:[%s686_s0 + $0x65] ss:$4 sm:%s79_s25]   ;;  %s13_s13 = smov 3 }
  0x1c   :  { %323 = vst.msk [vmem:[%s687_s1 + $0x14] ss:$8 sm:$0x3] %vm4_vm3, %v322_v59   ;;  %v326_v61 = vld [vmem:[%s686_s0 + $0x70] ss:$4 sm:%s85_s26]   ;;  %s19_s16 = smov 3 }
  0x1d   :  { %325 = vst.msk [vmem:[%s687_s1 + $0x15] ss:$8 sm:$0x3] %vm4_vm3, %v324_v60   ;;  %v328_v62 = vld [vmem:[%s686_s0 + $0x75] ss:$4 sm:%s91_s27]   ;;  %s25_s21 = smov 3 }
  0x1e   :  { %327 = vst.msk [vmem:[%s687_s1 + $0x16] ss:$8 sm:$0x3] %vm4_vm3, %v326_v61   ;;  %v3_v63 = vld [vmem:[%s686_s0] ss:$4 sm:%s2_s3]   ;;  %s31_s24 = smov 3 }
  0x1f   :  { %329 = vst.msk [vmem:[%s687_s1 + $0x17] ss:$8 sm:$0x3] %vm4_vm3, %v328_v62   ;;  %v300_v0 = vld [vmem:[%s686_s0 + $0x5] ss:$4 sm:%s7_s9]   ;;  %s37_s29 = smov 3 }
  0x20   :  { %5 = vst.msk [vmem:[%s687_s1] ss:$8 sm:$0x3] %vm4_vm3, %v3_v63   ;;  %v302_v1 = vld [vmem:[%s686_s0 + $0x10] ss:$4 sm:%s13_s13]   ;;  %s43_s5 = smov 3 }
  0x21   :  { %295 = vrot.lane.b32.xlu2 %v294_v50, %s382_s4  ;;  %301 = vst.msk [vmem:[%s687_s1 + $0x1] ss:$8 sm:$0x3] %vm4_vm3, %v300_v0   ;;  %v304_v2 = vld [vmem:[%s686_s0 + $0x15] ss:$4 sm:%s19_s16]  }
  0x22   :  { %303 = vst.msk [vmem:[%s687_s1 + $0x2] ss:$8 sm:$0x3] %vm4_vm3, %v302_v1   ;;  %v306_v3 = vld [vmem:[%s686_s0 + $0x20] ss:$4 sm:%s25_s21]  }
  0x23   :  { %305 = vst.msk [vmem:[%s687_s1 + $0x3] ss:$8 sm:$0x3] %vm4_vm3, %v304_v2   ;;  %v308_v4 = vld [vmem:[%s686_s0 + $0x25] ss:$4 sm:%s31_s24]  }
  0x24   :  { %307 = vst.msk [vmem:[%s687_s1 + $0x4] ss:$8 sm:$0x3] %vm4_vm3, %v306_v3   ;;  %v310_v5 = vld [vmem:[%s686_s0 + $0x30] ss:$4 sm:%s37_s29]  }
  0x25   :  { %309 = vst.msk [vmem:[%s687_s1 + $0x5] ss:$8 sm:$0x3] %vm4_vm3, %v308_v4   ;;  %v312_v6 = vld [vmem:[%s686_s0 + $0x35] ss:$4 sm:%s43_s5]  }
  0x26   :  { %311 = vst.msk [vmem:[%s687_s1 + $0x6] ss:$8 sm:$0x3] %vm4_vm3, %v310_v5  }
  0x27   :  { %313 = vst.msk [vmem:[%s687_s1 + $0x7] ss:$8 sm:$0x3] %vm4_vm3, %v312_v6  }
  0x6b   :  { %v221_v7 = vpop.permute.xlu2 %220  }
  0x73   :  { %v236_v8 = vpop.permute.xlu2 %235  }
  0x76   :  { %v176_v9 = vpop.permute.xlu1 %175  }
  0x77   :  { %350 = vst.msk [vmem:[%s687_s1 + $0x14] sm:$0xf] %vm140_vm4, %v176_v9  }
  0x78   :  { %363 = vst.msk [vmem:[%s687_s1 + $0x14] sm:$0xf] %vm200_vm5, %v236_v8   ;;  %v139_v10 = vpop.permute.xlu0 %138  }
  0x79   :  { %141 = vst.msk [vmem:[%s687_s1] sm:$0xff] %vm140_vm4, %v139_v10  }
  0x7b   :  { %v296_v11 = vpop.permute.xlu2 %295  }
  0x7c   :  { %376 = vst.msk [vmem:[%s687_s1 + $0x14] sm:$0xf] %vm260_vm6, %v296_v11  }
  0x7e   :  { %v199_v12 = vpop.permute.xlu1 %198  }
  0x7f   :  { %201 = vst.msk [vmem:[%s687_s1] sm:$0xff] %vm200_vm5, %v199_v12  }
  0x80   :  { %v161_v13 = vpop.permute.xlu0 %160  }
  0x81   :  { %346 = vst.msk [vmem:[%s687_s1 + $0x20] sm:$0xf] %vm140_vm4, %v161_v13  }
  0x82   :  { %347 = vst.msk [vmem:[%s687_s1 + $0xc] sm:$0xf0] %vm140_vm4, %v161_v13  }
  0x83   :  { %359 = vst.msk [vmem:[%s687_s1 + $0x20] sm:$0xf] %vm200_vm5, %v221_v7  }
  0x84   :  { %360 = vst.msk [vmem:[%s687_s1 + $0xc] sm:$0xf0] %vm200_vm5, %v221_v7  }
  0x86   :  { %v281_v14 = vpop.permute.xlu1 %280  }
  0x87   :  { %372 = vst.msk [vmem:[%s687_s1 + $0x20] sm:$0xf] %vm260_vm6, %v281_v14  }
  0x88   :  { %373 = vst.msk [vmem:[%s687_s1 + $0xc] sm:$0xf0] %vm260_vm6, %v281_v14   ;;  %v259_v15 = vpop.permute.xlu0 %258  }
  0x89   :  { %261 = vst.msk [vmem:[%s687_s1] sm:$0xff] %vm260_vm6, %v259_v15  }

// kernel: conv_compress_forward.1
= control target key start
LH: loop header
LB: loop body
LE: loop exit
PB: predicated region body
PF: predicated region fallthrough
CT: control target
= control target key end

     0   :  { %s661_s12 = smov 0   ;;  %s663_s13 = smov 0   ;;  %s757_s0 = inlined_call_operand.vmem [shape: bf16[5,2,4,160], index: 0, kind: input, shape index: {}]   ;;  %s758_s1 = inlined_call_operand.vmem [shape: bf16[160,32], index: 1, kind: input, shape index: {}]   ;;  %s759_s2 = inlined_call_operand.vmem [shape: f32[5,4,32], index: 2, kind: input, shape index: {}]   ;;  %s760_s3 = inlined_call_operand.vmem [shape: f32[2,4,32], index: 3, kind: output, shape index: {}]  }
   0x1   :  { %s665_s14 = smov 0   ;;  %s667_s15 = smov 0  }
   0x2   :  { %s669_s16 = smov 0  }
   0x3 LB: > { %s25_s17 = sadd.s32 1, %s630_s14  ;;  %s32_s18 = sadd.s32 1, %s634_s15  ;;  %s638_s16 = sphi %s669_s16, %s13_s16   ;;  %s634_s15 = sphi %s667_s15, %s764_s15   ;;  %s630_s14 = sphi %s665_s14, %s763_s14   ;;  %s626_s13 = sphi %s663_s13, %s762_s13   ;;  %s622_s12 = sphi %s661_s12, %s761_s12  }
   0x4   : > { %p26_p0 = scmp.ge.s32.totalorder %s25_s17, 5  ;;  %p498_p1 = scmp.ge.s32.totalorder %s638_s16, 1 }
   0x5   : > { %p184_p2 = scmp.lt.s32.totalorder %s638_s16, 11 }
   0x6   : > { %s766_s17 = smov (%p26_p0, %s25_s17), 0  ;;  %s768_s18 = smov (!%p26_p0, %s32_s18), %s634_s15 }
   0x7   : > { %p185_p3 = pnand %p498_p1, %p184_p2  ;;  %p34_p4 = scmp.ge.s32.totalorder %s768_s18, 2 }
   0x8   : > { %p225_p5 = scmp.lt.s32.totalorder (!%p185_p3), %s622_s12, 4  ;;  %p227_p6 = scmp.lt.s32.totalorder (!%p185_p3), %s626_s13, 1 }
   0x9   : > { %s770_s18 = smov (%p34_p4, %s768_s18), 0  ;;  %188 = sbr.rel (%p185_p3) target bundleno = 199 (0xc7), region = 32 }
   0xa   : > { %p504_p7 = scmp.ne.s32.totalorder (!%p185_p3), %s622_s12, 0 }
   0xe   : > { %s226_s19 = scalar_select %p225_p5, %s622_s12, 4 }
   0xf   : > { %s772_s13 = smov (!%p227_p6, %s626_s13), 1  ;;  %256 = sbr.rel (%p504_p7) target bundleno = 22 (0x16), region = 36 }
  0x10   : > { %s500_s20 = sshll.u32 %s226_s19, 2  ;;  %s499_s21 = sshll.u32 %s772_s13, 1 }
  0x11   : > { %s698_s24 = scalar_lea.vmem %s759_s2, %s500_s20  ;;  %s235_s25 = sadd.s32 %s500_s20, %s499_s21 }
  0x12   : > { %s503_s26 = sshll.u32 %s772_s13, 2  ;;  %s501_s27 = sshll.u32 %s235_s25, 1 }
  0x13   : > { %s703_s30 = scalar_lea.vmem %s760_s3, %s503_s26  ;;  %s237_s6 = scalar_lea.vmem %s757_s0, %s501_s27 }
  0x14   : > { %vm257_vm0 = vcmask 257024   ;;  %v640_v0 = vmov 0.0  }
  0x15   : > { %258 = vst.msk [vmem:[#allocation2] sm:$0xf] %vm257_vm0, %v640_v0 }
  0x16 PF: > { %v556_v1 = vld [vmem:[%s758_s1 + $0x38] sm:$0xff]  ;;  %v558_v2 = vld [vmem:[%s758_s1 + $0x48] sm:$0xff]  ;;  %v555_v3 = vld [vmem:[%s758_s1 + $0x30] sm:$0xff]  ;;  %vm347_vm1 = vcmask 261120   ;;  %vm378_vm2 = vcmask 257024   ;;  %p546_p8 = scmp.ne.s32.totalorder %s622_s12, 4 }
  0x17   : > { %350 = vmatpush.bf16.msra.mxu0 %v556_v1  ;;  %369 = vmatpush.bf16.msra.mxu1 %v558_v2  ;;  %v557_v4 = vld [vmem:[%s758_s1 + $0x40] sm:$0xff]  ;;  %v554_v6 = vld [vmem:[%s758_s1 + $0x28] sm:$0xff]  ;;  %v552_v9 = vld [vmem:[%s758_s1 + $0x18] sm:$0xff] }
  0x18   : > { %v259_v5 = vld [vmem:[%s237_s6] sm:$0xf]  ;;  %v551_v10 = vld [vmem:[%s758_s1 + $0x10] sm:$0xff]  ;;  %v550_v11 = vld [vmem:[%s758_s1 + $0x8] sm:$0xff] }
  0x19   : > { %283 = vst [vmem:[#allocation1] ss:$4 sm:$0xff] %v259_v5  ;;  %v553_v7 = vld [vmem:[%s758_s1 + $0x20] sm:$0xff] }
  0x1a   : > { %v549_v12 = vld [vmem:[%s758_s1] sm:$0xff] }
  0x1b   : > { %351 = vmatpush.bf16.msra.mxu0 %v555_v3  ;;  %370 = vmatpush.bf16.msra.mxu1 %v557_v4  ;;  %v281_v16 = vld [vmem:[%s698_s24] sm:$0xf] }
  0x1c   : > { %v280_v20 = vld [vmem:[#allocation2] sm:$0xf] }
  0x1f   : > { %352 = vmatpush.bf16.msra.mxu0 %v554_v6 }
  0x20   : > { %v285_v8 = vld.sshfl [vmem:[#allocation1 + $0x8] sm:$0xff pattern:$0x73625140]  ;;  %v284_v13 = vld.sshfl [vmem:[#allocation1] sm:$0xff pattern:$0x73625140] }
  0x21   : > { %545 = vmatmul.msk.bf16.vlgmr.msra.gmra.mxu1 %vm347_vm1, %v285_v8 }
  0x23   : > { %353 = vmatpush.bf16.msra.mxu0 %v553_v7 }
  0x27   : > { %354 = vmatpush.bf16.msra.mxu0 %v552_v9 }
  0x2b   : > { %355 = vmatpush.bf16.msra.mxu0 %v551_v10 }
  0x2f   : > { %356 = vmatpush.bf16.msra.mxu0 %v550_v11 }
  0x33   : > { %357 = vmatpush.bf16.msra.mxu0 %v549_v12 }
  0x36   : > { %358 = vmatmul.bf16.vlgmr.msra.gmra.mxu0 %v284_v13 }
  0x9e   : > { %v372_v14 = vpop.f32.mrf.mxu1 }
  0xa6   : > { %v374_v15 = vpop.f32.mrf.mxu1 }
  0xb3   : > { %v359_v17 = vpop.f32.mrf.mxu0 }
  0xb4   : > { %v360_v18 = vadd.f32 %v359_v17, %v281_v16 }
  0xb6   : > { %v373_v19 = vadd.f32 %v372_v14, %v360_v18 }
  0xb8   : > { %v376_v21 = vmax.f32 %v373_v19, 0.0  ;;  %383 = sbr.rel (%p546_p8) target bundleno = 199 (0xc7), region = 40 }
  0xba   : > { %v377_v22 = vadd.f32 %v376_v21, %v280_v20 }
  0xbb   : > { %v361_v23 = vpop.f32.mrf.mxu0 }
  0xbc   : > { %379 = vst.msk [vmem:[#allocation2] sm:$0xf] %vm378_vm2, %v377_v22 }
  0xc3   : > { %v384_v24 = vld [vmem:[#allocation2] sm:$0xf] }
  0xc4   : > { %v385_v25 = vmul.f32 0.2, %v384_v24 }
  0xc6   : > { %386 = vst.msk [vmem:[%s703_s30] sm:$0xf] %vm378_vm2, %v385_v25 }
  0xc7 PF: > { %s13_s16 = sadd.s32 1, %s638_s16   ;;  %s761_s12 = smov %s630_s14 }
  0xc8   : > { %p10_p9 = scmp.ge.s32.totalorder %s13_s16, 12   ;;  %s762_s13 = smov %s634_s15 }
  0xc9   : > { %s763_s14 = smov %s766_s17  ;;  %s764_s15 = smov %s770_s18 }
  0xca   :  { %12 = sbr.rel (!%p10_p9) target bundleno = 3 (0x3), region = 73 }

</bundles_post_ra>
